<compile_context>
chip_gen: v7x
topology: tpu7x:2x2x1
jax: 0.10.0
libtpu: 0.0.40
codegen_flags: <defaults>
</compile_context>

<pallas_src>
import functools

import jax
import jax.numpy as jnp
from jax.experimental import pallas as pl
from jax.experimental.pallas import tpu as pltpu

LANE = 128
SUBLANE = 8
TILE_N_CAP = 128 * 1024          # max lane-tile width (multiple of every chunk size)
CHUNK_CANDIDATES = (512, 256, 128)
TARGET_STEP_BYTES = 8 << 20      # aim >= ~8 MiB of input per grid step (v7x roofline)
VMEM_INPUT_BUDGET = 24 << 20     # 2 inputs x 2 pipeline buffers; safe on v7x (64 MiB VMEM)
ROWS_CAP = 1024                  # bounds lane-wide accumulators / output tile
VMEM_LIMIT_BYTES = 48 << 20      # raised scoped-VMEM limit (< v7x physical 64 MiB)


def _round_up(x: int, m: int) -> int:
    return ((x + m - 1) // m) * m


def _select_tiling(batch: int, n_elems: int, itemsize: int):
    """Pick (rows, rg, tile_n, chunk, num_n_tiles, rem) -- all static ints."""
    row_align = max(SUBLANE, 32 // itemsize)        # 8 (f32), 16 (bf16), 32 (int8/fp8)

    tile_n = min(_round_up(n_elems, LANE), TILE_N_CAP)
    num_n_tiles = pl.cdiv(n_elems, tile_n)
    rem = n_elems - (num_n_tiles - 1) * tile_n      # valid columns of the last N tile

    chunk = LANE
    for c in CHUNK_CANDIDATES:
        if tile_n % c == 0:
            chunk = c
            break

    if batch < row_align:
        rows = batch                                 # full-dim row block, nothing padded
    else:
        rows = row_align
        max_rows = min(_round_up(batch, row_align), ROWS_CAP)
        # Grow the row block until each grid step moves TARGET_STEP_BYTES of
        # input, while 2 inputs x 2 buffers stays inside the v7x-safe budget.
        while (2 * rows * tile_n * itemsize < TARGET_STEP_BYTES
               and 2 * rows <= max_rows
               and 4 * (2 * rows) * tile_n * itemsize <= VMEM_INPUT_BUDGET):
            rows *= 2
        # v7x megacore guard: keep >= 2 blocks on the "parallel" row axis if B allows.
        while rows > row_align and pl.cdiv(batch, rows) < 2:
            rows //= 2

    rg = min(row_align, rows)                        # rows processed per in-kernel group
    return rows, rg, tile_n, chunk, num_n_tiles, rem


def _accumulate_row_group(p_ref, l_ref, acc_refs, r0, *, rg, chunk, tile_n, valid_cols):
    """Fold one rg-row group of the current (rows, tile_n) tile into acc_refs.

    Loads (rg, chunk) column chunks, keeps five lane-wide (rg, 128) partial
    sums in vregs (pure VALU adds), and adds them into the persistent VMEM
    accumulators once per row group.  `valid_cols` (static) masks the N
    remainder of the last tile so no wrapper-side padding is ever needed.
    """
    n_chunks = tile_n // chunk
    n_sub = chunk // LANE

    def chunk_body(c, carry):
        c0 = c * chunk
        if not isinstance(c0, int):
            c0 = pl.multiple_of(c0, chunk)
        p = p_ref[pl.ds(r0, rg), pl.ds(c0, chunk)].astype(jnp.float32)
        l = l_ref[pl.ds(r0, rg), pl.ds(c0, chunk)].astype(jnp.float32)
        if valid_cols < tile_n:
            # Only generated for the (partial) last N tile: zero out-of-range
            # columns so the sums and counts stay exact without padding inputs.
            col = c0 + jax.lax.broadcasted_iota(jnp.int32, (rg, chunk), 1)
            keep = col < valid_cols
            p = jnp.where(keep, p, 0.0)
            l = jnp.where(keep, l, 0.0)
        ax, ay, axy, ax2, ay2 = carry
        for s in range(n_sub):                       # static: slices pick whole vregs
            ps = p[:, s * LANE:(s + 1) * LANE]
            ls = l[:, s * LANE:(s + 1) * LANE]
            ax = ax + ps
            ay = ay + ls
            axy = axy + ps * ls
            ax2 = ax2 + ps * ps
            ay2 = ay2 + ls * ls
        return ax, ay, axy, ax2, ay2

    init = (jnp.zeros((rg, LANE), jnp.float32),) * 5
    if n_chunks == 1:
        partials = chunk_body(0, init)
    else:
        partials = jax.lax.fori_loop(0, n_chunks, chunk_body, init)

    for ref, part in zip(acc_refs, partials):
        ref[pl.ds(r0, rg), :] += part


def _np_loss_kernel(p_ref, l_ref, out_ref,
                    sx_ref, sy_ref, sxy_ref, sx2_ref, sy2_ref, *,
                    n_elems, num_n_tiles, tile_n, rem, rows, rg, chunk):
    k = pl.program_id(1)
    acc_refs = (sx_ref, sy_ref, sxy_ref, sx2_ref, sy2_ref)

    @pl.when(k == 0)
    def _init():
        zeros = jnp.zeros((rows, LANE), jnp.float32)
        for ref in acc_refs:
            ref[...] = zeros

    n_groups = rows // rg

    def accumulate(valid_cols):
        if n_groups == 1:
            _accumulate_row_group(p_ref, l_ref, acc_refs, 0, rg=rg, chunk=chunk,
                                  tile_n=tile_n, valid_cols=valid_cols)
        else:
            @pl.loop(0, n_groups)
            def _(g):
                r0 = pl.multiple_of(g * rg, rg)
                _accumulate_row_group(p_ref, l_ref, acc_refs, r0, rg=rg, chunk=chunk,
                                      tile_n=tile_n, valid_cols=valid_cols)

    if num_n_tiles == 1:
        accumulate(rem)              # rem == tile_n -> unmasked; rem < tile_n -> masked
    elif rem == tile_n:
        accumulate(tile_n)           # tile_n divides N: hot path is never masked
    else:
        @pl.when(k < num_n_tiles - 1)
        def _full_tiles():
            accumulate(tile_n)

        @pl.when(k == num_n_tiles - 1)
        def _last_tile():
            accumulate(rem)

    # NOTE: out_ref is written only on the last N tile.  This is safe because
    # the reduction (N) axis is the LAST grid axis, the output block index is
    # constant across it, and that axis is marked "arbitrary".  Do not reorder
    # the grid without revisiting this.
    @pl.when(k == num_n_tiles - 1)
    def _finalize():
        n = jnp.float32(n_elems)
        sum_x = jnp.sum(sx_ref[...], axis=-1, keepdims=True)
        sum_y = jnp.sum(sy_ref[...], axis=-1, keepdims=True)
        sum_xy = jnp.sum(sxy_ref[...], axis=-1, keepdims=True)
        sum_x2 = jnp.sum(sx2_ref[...], axis=-1, keepdims=True)
        sum_y2 = jnp.sum(sy2_ref[...], axis=-1, keepdims=True)
        numerator = n * sum_xy - sum_x * sum_y
        # f32 cancellation can drive the variance terms slightly negative;
        # clamp so rsqrt cannot produce NaN.
        var_x = jnp.maximum(n * sum_x2 - sum_x * sum_x, jnp.float32(0.0))
        var_y = jnp.maximum(n * sum_y2 - sum_y * sum_y, jnp.float32(0.0))
        den2 = var_x * var_y
        # pearson = numerator / sqrt(den2), and 0 when the denominator is 0
        # (matches the reference's `if denominator == 0` branch).  rsqrt runs
        # on the EUP, off the VALU critical path.
        pearson = jnp.where(den2 > jnp.float32(0.0),
                            numerator * jax.lax.rsqrt(den2),
                            jnp.float32(0.0))
        out_ref[...] = (jnp.float32(1.0) - pearson).astype(out_ref.dtype)


def np_loss(preds: jax.Array, labels: jax.Array) -> jax.Array:
    """Mean over the batch of (1 - pearson(preds[i], labels[i])).

    Accepts any float dtype (bf16 inputs halve HBM traffic for this
    bandwidth-bound kernel); accumulation is always f32.  Inputs are never
    padded or copied on the host/wrapper side.
    """
    assert preds.shape == labels.shape and preds.ndim == 2
    B, N = preds.shape
    itemsize = max(jnp.dtype(preds.dtype).itemsize, jnp.dtype(labels.dtype).itemsize)

    rows, rg, tile_n, chunk, num_n_tiles, rem = _select_tiling(B, N, itemsize)
    num_row_blocks = pl.cdiv(B, rows)
    b_out = num_row_blocks * rows        # only the tiny OUTPUT is padded; sliced below

    # Deeper input pipelining for long N streams when the VMEM budget allows
    # (hides DMA ramp / step-boundary bubbles on v5e/v6e with the raised limit).
    n_buffers = 3 if (num_n_tiles >= 4
                      and 2 * 3 * rows * tile_n * itemsize <= VMEM_INPUT_BUDGET) else 2

    def in_spec():
        if n_buffers > 2:
            return pl.BlockSpec((rows, tile_n), lambda i, k: (i, k),
                                pipeline_mode=pl.Buffered(n_buffers))
        return pl.BlockSpec((rows, tile_n), lambda i, k: (i, k))

    kernel = functools.partial(
        _np_loss_kernel, n_elems=N, num_n_tiles=num_n_tiles, tile_n=tile_n,
        rem=rem, rows=rows, rg=rg, chunk=chunk)

    per_row = pl.pallas_call(
        kernel,
        out_shape=jax.ShapeDtypeStruct((b_out, 1), jnp.float32),
        grid_spec=pltpu.PrefetchScalarGridSpec(
            num_scalar_prefetch=0,
            grid=(num_row_blocks, num_n_tiles),       # reduction (N) axis last
            in_specs=[in_spec(), in_spec()],
            out_specs=pl.BlockSpec((rows, 1), lambda i, k: (i, 0)),
            scratch_shapes=[pltpu.VMEM((rows, LANE), jnp.float32) for _ in range(5)],
        ),
        compiler_params=pltpu.CompilerParams(
            dimension_semantics=("parallel", "arbitrary"),
            vmem_limit_bytes=VMEM_LIMIT_BYTES,
        ),
    )(preds, labels)

    # Rows >= B of the (partial) last row block hold garbage losses; drop them
    # before the mean.  Per-row f32 accumulation matches typical f32 torch sums.
    return jnp.mean(per_row[:B, 0])


def _np_loss_reference(preds, labels):
    """Pure-jnp reference (mirrors the PyTorch module)."""
    p = preds.astype(jnp.float32)
    l = labels.astype(jnp.float32)
    n = jnp.float32(p.shape[1])
    sx = jnp.sum(p, axis=1)
    sy = jnp.sum(l, axis=1)
    sxy = jnp.sum(p * l, axis=1)
    sx2 = jnp.sum(p * p, axis=1)
    sy2 = jnp.sum(l * l, axis=1)
    num = n * sxy - sx * sy
    den = jnp.sqrt((n * sx2 - sx * sx) * (n * sy2 - sy * sy))
    pearson = jnp.where(den == 0, 0.0, num / den)
    return jnp.mean(1.0 - pearson)


if __name__ == "__main__":
    key = jax.random.PRNGKey(0)
    k1, k2, k3, k4 = jax.random.split(key, 4)

    # Case 1: small, exactly-aligned shapes (module contract: (B, N)).
    B, N = 4, 256
    preds = jax.random.normal(k1, (B, N), dtype=jnp.float32)
    labels = 0.7 * preds + 0.3 * jax.random.normal(k2, (B, N), dtype=jnp.float32)
    out = np_loss(preds, labels)
    jax.block_until_ready(out)
    ref = _np_loss_reference(preds, labels)
    assert abs(float(out) - float(ref)) < 5e-4, (float(out), float(ref))

    # Case 2: ragged shapes (B % 8 != 0, N % 128 != 0) exercising the pad-free
    # masked last tile, the partial last row block and the row-group loop.
    B2, N2 = 20, 1000
    p2 = jax.random.normal(k3, (B2, N2), dtype=jnp.float32)
    l2 = 0.5 * p2 + 0.5 * jax.random.normal(k4, (B2, N2), dtype=jnp.float32)
    out2 = np_loss(p2, l2)
    jax.block_until_ready(out2)
    ref2 = _np_loss_reference(p2, l2)
    assert abs(float(out2) - float(ref2)) < 5e-4, (float(out2), float(ref2))

    print("KERNEL_OK")
</pallas_src>

<mosaic_0001>
module attributes {stable_mosaic.version = 11 : i64} {
  func.func @_np_loss_kernel(%arg0: i32, %arg1: i32, %arg2: memref<4x256xf32, #tpu.memory_space<vmem>>, %arg3: memref<4x256xf32, #tpu.memory_space<vmem>>, %arg4: memref<4x1xf32, #tpu.memory_space<vmem>>, %arg5: memref<4x128xf32, #tpu.memory_space<vmem>>, %arg6: memref<4x128xf32, #tpu.memory_space<vmem>>, %arg7: memref<4x128xf32, #tpu.memory_space<vmem>>, %arg8: memref<4x128xf32, #tpu.memory_space<vmem>>, %arg9: memref<4x128xf32, #tpu.memory_space<vmem>>) attributes {dimension_semantics = [#tpu.dimension_semantics<parallel>, #tpu.dimension_semantics<arbitrary>], iteration_bounds = array<i64: 1, 1>, scalar_prefetch = 0 : i64, scratch_operands = 5 : i64, tpu.core_type = #tpu.core_type<tc>, window_params = [{transform_indices = @transform_0, window_bounds = array<i64: 4, 256>}, {transform_indices = @transform_1, window_bounds = array<i64: 4, 256>}, {transform_indices = @transform_2, window_bounds = array<i64: 4, 1>}]} {
    %c0_i32 = arith.constant 0 : i32
    %0 = arith.cmpi eq, %arg1, %c0_i32 : i32
    %1 = arith.extui %0 : i1 to i32
    %c0_i32_0 = arith.constant 0 : i32
    %2 = arith.cmpi ne, %1, %c0_i32_0 : i32
    scf.if %2 {
      %cst_26 = arith.constant 0.000000e+00 : f32
      %44 = vector.broadcast %cst_26 : f32 to vector<4x128xf32>
      %c0_27 = arith.constant 0 : index
      %c0_28 = arith.constant 0 : index
      %45 = vector.load %arg5[%c0_27, %c0_28] : memref<4x128xf32, #tpu.memory_space<vmem>>, vector<4x128xf32>
      tpu.vector_store %arg5[%c0_27, %c0_28], %44 {strides = array<i32>} : memref<4x128xf32, #tpu.memory_space<vmem>>, vector<4x128xf32>,
      %c0_29 = arith.constant 0 : index
      %c0_30 = arith.constant 0 : index
      %46 = vector.load %arg6[%c0_29, %c0_30] : memref<4x128xf32, #tpu.memory_space<vmem>>, vector<4x128xf32>
      tpu.vector_store %arg6[%c0_29, %c0_30], %44 {strides = array<i32>} : memref<4x128xf32, #tpu.memory_space<vmem>>, vector<4x128xf32>,
      %c0_31 = arith.constant 0 : index
      %c0_32 = arith.constant 0 : index
      %47 = vector.load %arg7[%c0_31, %c0_32] : memref<4x128xf32, #tpu.memory_space<vmem>>, vector<4x128xf32>
      tpu.vector_store %arg7[%c0_31, %c0_32], %44 {strides = array<i32>} : memref<4x128xf32, #tpu.memory_space<vmem>>, vector<4x128xf32>,
      %c0_33 = arith.constant 0 : index
      %c0_34 = arith.constant 0 : index
      %48 = vector.load %arg8[%c0_33, %c0_34] : memref<4x128xf32, #tpu.memory_space<vmem>>, vector<4x128xf32>
      tpu.vector_store %arg8[%c0_33, %c0_34], %44 {strides = array<i32>} : memref<4x128xf32, #tpu.memory_space<vmem>>, vector<4x128xf32>,
      %c0_35 = arith.constant 0 : index
      %c0_36 = arith.constant 0 : index
      %49 = vector.load %arg9[%c0_35, %c0_36] : memref<4x128xf32, #tpu.memory_space<vmem>>, vector<4x128xf32>
      tpu.vector_store %arg9[%c0_35, %c0_36], %44 {strides = array<i32>} : memref<4x128xf32, #tpu.memory_space<vmem>>, vector<4x128xf32>,
    } else {
    }
    %cst = arith.constant 0.000000e+00 : f32
    %3 = vector.broadcast %cst : f32 to vector<4x128xf32>
    %c0 = arith.constant 0 : index
    %c0_1 = arith.constant 0 : index
    %4 = vector.load %arg2[%c0, %c0_1] : memref<4x256xf32, #tpu.memory_space<vmem>>, vector<4x256xf32>
    %c0_2 = arith.constant 0 : index
    %c0_3 = arith.constant 0 : index
    %5 = vector.load %arg3[%c0_2, %c0_3] : memref<4x256xf32, #tpu.memory_space<vmem>>, vector<4x256xf32>
    %6 = vector.extract_strided_slice %4 {offsets = [0, 0], sizes = [4, 128], strides = [1, 1]} : vector<4x256xf32> to vector<4x128xf32>
    %7 = vector.extract_strided_slice %5 {offsets = [0, 0], sizes = [4, 128], strides = [1, 1]} : vector<4x256xf32> to vector<4x128xf32>
    %8 = arith.addf %3, %6 : vector<4x128xf32>
    %9 = arith.addf %3, %7 : vector<4x128xf32>
    %10 = arith.mulf %6, %7 : vector<4x128xf32>
    %11 = arith.addf %3, %10 : vector<4x128xf32>
    %12 = arith.mulf %6, %6 : vector<4x128xf32>
    %13 = arith.addf %3, %12 : vector<4x128xf32>
    %14 = arith.mulf %7, %7 : vector<4x128xf32>
    %15 = arith.addf %3, %14 : vector<4x128xf32>
    %16 = vector.extract_strided_slice %4 {offsets = [0, 128], sizes = [4, 128], strides = [1, 1]} : vector<4x256xf32> to vector<4x128xf32>
    %17 = vector.extract_strided_slice %5 {offsets = [0, 128], sizes = [4, 128], strides = [1, 1]} : vector<4x256xf32> to vector<4x128xf32>
    %18 = arith.addf %8, %16 : vector<4x128xf32>
    %19 = arith.addf %9, %17 : vector<4x128xf32>
    %20 = arith.mulf %16, %17 : vector<4x128xf32>
    %21 = arith.addf %11, %20 : vector<4x128xf32>
    %22 = arith.mulf %16, %16 : vector<4x128xf32>
    %23 = arith.addf %13, %22 : vector<4x128xf32>
    %24 = arith.mulf %17, %17 : vector<4x128xf32>
    %25 = arith.addf %15, %24 : vector<4x128xf32>
    %c0_4 = arith.constant 0 : index
    %c0_5 = arith.constant 0 : index
    %26 = vector.load %arg5[%c0_4, %c0_5] : memref<4x128xf32, #tpu.memory_space<vmem>>, vector<4x128xf32>
    %27 = arith.addf %26, %18 : vector<4x128xf32>
    %c0_6 = arith.constant 0 : index
    %c0_7 = arith.constant 0 : index
    %28 = vector.load %arg5[%c0_6, %c0_7] : memref<4x128xf32, #tpu.memory_space<vmem>>, vector<4x128xf32>
    tpu.vector_store %arg5[%c0_6, %c0_7], %27 {strides = array<i32>} : memref<4x128xf32, #tpu.memory_space<vmem>>, vector<4x128xf32>,
    %c0_8 = arith.constant 0 : index
    %c0_9 = arith.constant 0 : index
    %29 = vector.load %arg6[%c0_8, %c0_9] : memref<4x128xf32, #tpu.memory_space<vmem>>, vector<4x128xf32>
    %30 = arith.addf %29, %19 : vector<4x128xf32>
    %c0_10 = arith.constant 0 : index
    %c0_11 = arith.constant 0 : index
    %31 = vector.load %arg6[%c0_10, %c0_11] : memref<4x128xf32, #tpu.memory_space<vmem>>, vector<4x128xf32>
    tpu.vector_store %arg6[%c0_10, %c0_11], %30 {strides = array<i32>} : memref<4x128xf32, #tpu.memory_space<vmem>>, vector<4x128xf32>,
    %c0_12 = arith.constant 0 : index
    %c0_13 = arith.constant 0 : index
    %32 = vector.load %arg7[%c0_12, %c0_13] : memref<4x128xf32, #tpu.memory_space<vmem>>, vector<4x128xf32>
    %33 = arith.addf %32, %21 : vector<4x128xf32>
    %c0_14 = arith.constant 0 : index
    %c0_15 = arith.constant 0 : index
    %34 = vector.load %arg7[%c0_14, %c0_15] : memref<4x128xf32, #tpu.memory_space<vmem>>, vector<4x128xf32>
    tpu.vector_store %arg7[%c0_14, %c0_15], %33 {strides = array<i32>} : memref<4x128xf32, #tpu.memory_space<vmem>>, vector<4x128xf32>,
    %c0_16 = arith.constant 0 : index
    %c0_17 = arith.constant 0 : index
    %35 = vector.load %arg8[%c0_16, %c0_17] : memref<4x128xf32, #tpu.memory_space<vmem>>, vector<4x128xf32>
    %36 = arith.addf %35, %23 : vector<4x128xf32>
    %c0_18 = arith.constant 0 : index
    %c0_19 = arith.constant 0 : index
    %37 = vector.load %arg8[%c0_18, %c0_19] : memref<4x128xf32, #tpu.memory_space<vmem>>, vector<4x128xf32>
    tpu.vector_store %arg8[%c0_18, %c0_19], %36 {strides = array<i32>} : memref<4x128xf32, #tpu.memory_space<vmem>>, vector<4x128xf32>,
    %c0_20 = arith.constant 0 : index
    %c0_21 = arith.constant 0 : index
    %38 = vector.load %arg9[%c0_20, %c0_21] : memref<4x128xf32, #tpu.memory_space<vmem>>, vector<4x128xf32>
    %39 = arith.addf %38, %25 : vector<4x128xf32>
    %c0_22 = arith.constant 0 : index
    %c0_23 = arith.constant 0 : index
    %40 = vector.load %arg9[%c0_22, %c0_23] : memref<4x128xf32, #tpu.memory_space<vmem>>, vector<4x128xf32>
    tpu.vector_store %arg9[%c0_22, %c0_23], %39 {strides = array<i32>} : memref<4x128xf32, #tpu.memory_space<vmem>>, vector<4x128xf32>,
    %c0_i32_24 = arith.constant 0 : i32
    %41 = arith.cmpi eq, %arg1, %c0_i32_24 : i32
    %42 = arith.extui %41 : i1 to i32
    %c0_i32_25 = arith.constant 0 : i32
    %43 = arith.cmpi ne, %42, %c0_i32_25 : i32
    scf.if %43 {
      %c0_26 = arith.constant 0 : index
      %c0_27 = arith.constant 0 : index
      %44 = vector.load %arg5[%c0_26, %c0_27] : memref<4x128xf32, #tpu.memory_space<vmem>>, vector<4x128xf32>
      %cst_28 = arith.constant dense<0.000000e+00> : vector<4xf32>
      %45 = vector.multi_reduction <add>, %44, %cst_28 [1] : vector<4x128xf32> to vector<4xf32>
      %46 = vector.shape_cast %45 : vector<4xf32> to vector<4x1xf32>
      %c0_29 = arith.constant 0 : index
      %c0_30 = arith.constant 0 : index
      %47 = vector.load %arg6[%c0_29, %c0_30] : memref<4x128xf32, #tpu.memory_space<vmem>>, vector<4x128xf32>
      %cst_31 = arith.constant dense<0.000000e+00> : vector<4xf32>
      %48 = vector.multi_reduction <add>, %47, %cst_31 [1] : vector<4x128xf32> to vector<4xf32>
      %49 = vector.shape_cast %48 : vector<4xf32> to vector<4x1xf32>
      %c0_32 = arith.constant 0 : index
      %c0_33 = arith.constant 0 : index
      %50 = vector.load %arg7[%c0_32, %c0_33] : memref<4x128xf32, #tpu.memory_space<vmem>>, vector<4x128xf32>
      %cst_34 = arith.constant dense<0.000000e+00> : vector<4xf32>
      %51 = vector.multi_reduction <add>, %50, %cst_34 [1] : vector<4x128xf32> to vector<4xf32>
      %52 = vector.shape_cast %51 : vector<4xf32> to vector<4x1xf32>
      %c0_35 = arith.constant 0 : index
      %c0_36 = arith.constant 0 : index
      %53 = vector.load %arg8[%c0_35, %c0_36] : memref<4x128xf32, #tpu.memory_space<vmem>>, vector<4x128xf32>
      %cst_37 = arith.constant dense<0.000000e+00> : vector<4xf32>
      %54 = vector.multi_reduction <add>, %53, %cst_37 [1] : vector<4x128xf32> to vector<4xf32>
      %55 = vector.shape_cast %54 : vector<4xf32> to vector<4x1xf32>
      %c0_38 = arith.constant 0 : index
      %c0_39 = arith.constant 0 : index
      %56 = vector.load %arg9[%c0_38, %c0_39] : memref<4x128xf32, #tpu.memory_space<vmem>>, vector<4x128xf32>
      %cst_40 = arith.constant dense<0.000000e+00> : vector<4xf32>
      %57 = vector.multi_reduction <add>, %56, %cst_40 [1] : vector<4x128xf32> to vector<4xf32>
      %58 = vector.shape_cast %57 : vector<4xf32> to vector<4x1xf32>
      %cst_41 = arith.constant 2.560000e+02 : f32
      %59 = vector.broadcast %cst_41 : f32 to vector<4x1xf32>
      %60 = arith.mulf %59, %52 : vector<4x1xf32>
      %61 = arith.mulf %46, %49 : vector<4x1xf32>
      %62 = arith.subf %60, %61 : vector<4x1xf32>
      %cst_42 = arith.constant 2.560000e+02 : f32
      %63 = vector.broadcast %cst_42 : f32 to vector<4x1xf32>
      %64 = arith.mulf %63, %55 : vector<4x1xf32>
      %65 = arith.mulf %46, %46 : vector<4x1xf32>
      %66 = arith.subf %64, %65 : vector<4x1xf32>
      %cst_43 = arith.constant 0.000000e+00 : f32
      %67 = vector.broadcast %cst_43 : f32 to vector<4x1xf32>
      %68 = arith.maximumf %66, %67 : vector<4x1xf32>
      %cst_44 = arith.constant 2.560000e+02 : f32
      %69 = vector.broadcast %cst_44 : f32 to vector<4x1xf32>
      %70 = arith.mulf %69, %58 : vector<4x1xf32>
      %71 = arith.mulf %49, %49 : vector<4x1xf32>
      %72 = arith.subf %70, %71 : vector<4x1xf32>
      %cst_45 = arith.constant 0.000000e+00 : f32
      %73 = vector.broadcast %cst_45 : f32 to vector<4x1xf32>
      %74 = arith.maximumf %72, %73 : vector<4x1xf32>
      %75 = arith.mulf %68, %74 : vector<4x1xf32>
      %cst_46 = arith.constant 0.000000e+00 : f32
      %76 = vector.broadcast %cst_46 : f32 to vector<4x1xf32>
      %77 = arith.cmpf ogt, %75, %76 : vector<4x1xf32>
      %78 = math.rsqrt %75 : vector<4x1xf32>
      %79 = arith.mulf %62, %78 : vector<4x1xf32>
      %cst_47 = arith.constant 0.000000e+00 : f32
      %80 = vector.broadcast %cst_47 : f32 to vector<4x1xf32>
      %81 = arith.select %77, %79, %80 : vector<4x1xi1>, vector<4x1xf32>
      %cst_48 = arith.constant 1.000000e+00 : f32
      %82 = vector.broadcast %cst_48 : f32 to vector<4x1xf32>
      %83 = arith.subf %82, %81 : vector<4x1xf32>
      %c0_49 = arith.constant 0 : index
      %c0_50 = arith.constant 0 : index
      %84 = vector.load %arg4[%c0_49, %c0_50] : memref<4x1xf32, #tpu.memory_space<vmem>>, vector<4x1xf32>
      tpu.vector_store %arg4[%c0_49, %c0_50], %83 {strides = array<i32>} : memref<4x1xf32, #tpu.memory_space<vmem>>, vector<4x1xf32>,
    } else {
    }
    return
  }
  func.func @transform_0(%arg0: i32, %arg1: i32) -> (i32, i32) {
    %c0_i32 = arith.constant 0 : i32
    return %arg0, %arg1 : i32, i32
  }
  func.func @transform_1(%arg0: i32, %arg1: i32) -> (i32, i32) {
    %c0_i32 = arith.constant 0 : i32
    return %arg0, %arg1 : i32, i32
  }
  func.func @transform_2(%arg0: i32, %arg1: i32) -> (i32, i32) {
    %c0_i32 = arith.constant 0 : i32
    %c0_i32_0 = arith.constant 0 : i32
    return %arg0, %c0_i32 : i32, i32
  }
}

</mosaic_0001>

<bundles_post_ra>
// kernel: tpu_custom_call.1
= control target key start
LH: loop header
LB: loop body
LE: loop exit
PB: predicated region body
PF: predicated region fallthrough
CT: control target
= control target key end

     0   :  { %7 = vsyncpa [#allocation8], 0  ;;  %s230_s0 = inlined_call_operand.hbm [shape: f32[4,256], index: 0, kind: input, shape index: {}]   ;;  %s231_s1 = inlined_call_operand.hbm [shape: f32[4,256], index: 1, kind: input, shape index: {}]   ;;  %s232_s2 = inlined_call_operand.vmem [shape: f32[4,1], index: 2, kind: output, shape index: {}]  }
   0x1   :  { %8 = vsyncpa [#allocation10], 0  ;;  %s185_s9 = smov [#allocation7]   ;;  %s186_s11 = smov [#allocation9]  }
   0x2   :  { %s15_s10 = sshll.u32 %s185_s9, 4  ;;  %s25_s12 = sshll.u32 %s186_s11, 4  ;;  %s16_s10 = int_to_ptr.vmem [resolvable:$true] %s15_s10  ;;  %s26_s12 = int_to_ptr.vmem [resolvable:$true] %s25_s12 }
   0x3   :  { %s137_s15 = scalar_lea.hbm %s230_s0, 128 }
   0x4   :  { %p138_p0 = scmp.ne.s32.totalorder %s230_s0, %s137_s15  ;;  %p141_p1 = scmp.lt.u32.totalorder %s137_s15, %s230_s0 }
   0x6   :  { %p143_p2 = pnand %p141_p1, %p138_p0 }
   0x8   :  { %146 = shalt.err (!%p143_p2)
}
   0x9   :  { %s147_s20 = scalar_lea.vmem %s16_s10, 128  ;;  %p152_p4 = scmp.lt.s32.totalorder %s16_s10, %s16_s10 }
   0xa   :  { %p148_p3 = scmp.ne.s32.totalorder %s16_s10, %s147_s20  ;;  %p153_p5 = scmp.lt.s32.totalorder %s147_s20, %s147_s20 }
   0xc   :  { %p154_p6 = por %p153_p5, %p152_p4 }
   0xe   :  { %p155_p7 = pnand %p154_p6, %p148_p3 }
  0x10   :  { %158 = shalt.err (!%p155_p7)
}
  0x11   :  { %18 = dma.hbm_to_vmem [thread:$0]  %s230_s0, 128, %s16_s10, [#allocation8]  }
  0x12   :  { %s159_s25 = scalar_lea.hbm %s231_s1, 128 }
  0x13   :  { %p160_p8 = scmp.ne.s32.totalorder %s231_s1, %s159_s25  ;;  %p163_p9 = scmp.lt.u32.totalorder %s159_s25, %s231_s1 }
  0x15   :  { %p165_p10 = pnand %p163_p9, %p160_p8 }
  0x17   :  { %168 = shalt.err (!%p165_p10)
}
  0x18   :  { %s169_s30 = scalar_lea.vmem %s26_s12, 128  ;;  %p174_p12 = scmp.lt.s32.totalorder %s26_s12, %s26_s12 }
  0x19   :  { %p170_p11 = scmp.ne.s32.totalorder %s26_s12, %s169_s30  ;;  %p175_p13 = scmp.lt.s32.totalorder %s169_s30, %s169_s30 }
  0x1b   :  { %p176_p0 = por %p175_p13, %p174_p12 }
  0x1d   :  { %p177_p1 = pnand %p176_p0, %p170_p11 }
  0x1f   :  { %180 = shalt.err (!%p177_p1)
}
  0x20   :  { %28 = dma.hbm_to_vmem [thread:$0]  %s231_s1, 128, %s26_s12, [#allocation10]  }
  0x21   :  { %181 = dma.done.wait [#allocation8], 128  }
  0x22   :  { %182 = vsyncadd [#allocation8], 4294967168 }
  0x23   :  { %183 = dma.done.wait [#allocation10], 128  }
  0x24   :  { %184 = vsyncadd [#allocation10], 4294967168  ;;  %v187_v0 = vmov 0.0   ;;  %v44_v1 = vld [vmem:[#allocation7] sm:$0xff]  ;;  %v45_v2 = vld [vmem:[#allocation9] sm:$0xff]  ;;  %vm87_vm0 = vcmask 1043456  }
  0x25   :  { %39 = vst [vmem:[#allocation2] sm:$0xf] %v187_v0  ;;  %40 = vst [vmem:[#allocation3] sm:$0xf] %v187_v0  ;;  %v55_v3 = vrot.slane %v44_v1, 4  ;;  %v50_v4 = vmul.f32 %v44_v1, %v44_v1  ;;  %v59_v5 = vrot.slane %v45_v2, 4  ;;  %v52_v6 = vmul.f32 %v45_v2, %v45_v2 }
  0x26   :  { %41 = vst [vmem:[#allocation4] sm:$0xf] %v187_v0  ;;  %42 = vst [vmem:[#allocation5] sm:$0xf] %v187_v0  ;;  %v48_v9 = vmul.f32 %v45_v2, %v44_v1  ;;  %vm124_vm2 = vcmask 3072  }
  0x27   :  { %43 = vst [vmem:[#allocation6] sm:$0xf] %v187_v0  ;;  %v57_v10 = vadd.f32 %v55_v3, %v44_v1  ;;  %v64_v11 = vmul.f32 %v55_v3, %v55_v3  ;;  %v61_v12 = vadd.f32 %v59_v5, %v45_v2  ;;  %v66_v13 = vmul.f32 %v59_v5, %v59_v5 }
  0x28   :  { %v62_v16 = vmul.f32 %v59_v5, %v55_v3 }
  0x29   :  { %v65_v18 = vadd.f32 %v64_v11, %v50_v4  ;;  %v67_v20 = vadd.f32 %v66_v13, %v52_v6 }
  0x2a   :  { %v63_v22 = vadd.f32 %v62_v16, %v48_v9 }
  0x2c   :  { %v68_v7 = vld [vmem:[#allocation2] sm:$0xf]  ;;  %v71_v8 = vld [vmem:[#allocation3] sm:$0xf] }
  0x2d   :  { %v77_v14 = vld [vmem:[#allocation5] sm:$0xf]  ;;  %v69_v17 = vadd.f32 %v68_v7, %v57_v10  ;;  %v72_v19 = vadd.f32 %v71_v8, %v61_v12  ;;  %v74_v21 = vld [vmem:[#allocation4] sm:$0xf] }
  0x2e   :  { %v80_v15 = vld [vmem:[#allocation6] sm:$0xf]  ;;  %v78_v23 = vadd.f32 %v77_v14, %v65_v18  ;;  %v75_v25 = vadd.f32 %v74_v21, %v63_v22 }
  0x2f   :  { %70 = vst [vmem:[#allocation2] sm:$0xf] %v69_v17  ;;  %73 = vst [vmem:[#allocation3] sm:$0xf] %v72_v19  ;;  %v81_v24 = vadd.f32 %v80_v15, %v67_v20 }
  0x30   :  { %79 = vst [vmem:[#allocation5] sm:$0xf] %v78_v23  ;;  %76 = vst [vmem:[#allocation4] sm:$0xf] %v75_v25 }
  0x31   :  { %82 = vst [vmem:[#allocation6] sm:$0xf] %v81_v24 }
  0x36   :  { %v86_v26 = vld [vmem:[#allocation2] sm:$0xf]  ;;  %v91_v27 = vld [vmem:[#allocation3] sm:$0xf] }
  0x37   :  { %v88_v28 = vsel %vm87_vm0, %v86_v26, 0.0  ;;  %v99_v29 = vld [vmem:[#allocation5] sm:$0xf]  ;;  %v92_v32 = vsel %vm87_vm0, %v91_v27, 0.0  ;;  %v95_v33 = vld [vmem:[#allocation4] sm:$0xf] }
  0x38   :  { %89 = vadd.xlane.f32.xlu0 %v88_v28  ;;  %v103_v30 = vld [vmem:[#allocation6] sm:$0xf]  ;;  %v100_v31 = vsel %vm87_vm0, %v99_v29, 0.0  ;;  %v96_v35 = vsel %vm87_vm0, %v95_v33, 0.0 }
  0x39   :  { %101 = vadd.xlane.f32.xlu1 %v100_v31  ;;  %v104_v34 = vsel %vm87_vm0, %v103_v30, 0.0 }
  0x3c   :  { %93 = vadd.xlane.f32.xlu0 %v92_v32 }
  0x3d   :  { %105 = vadd.xlane.f32.xlu1 %v104_v34 }
  0x40   :  { %97 = vadd.xlane.f32.xlu0 %v96_v35 }
  0xc5   :  { %v90_v36 = vpop.xlane.xlu0 %89 }
  0xc6   :  { %v102_v37 = vpop.xlane.xlu1 %101  ;;  %v111_v38 = vmul.f32 %v90_v36, %v90_v36 }
  0xc7   :  { %v110_v39 = vmul.f32 256.0, %v102_v37 }
  0xc9   :  { %v94_v40 = vpop.xlane.xlu0 %93  ;;  %v112_v43 = vsub.f32 %v110_v39, %v111_v38 }
  0xca   :  { %v115_v41 = vmul.f32 %v94_v40, %v94_v40  ;;  %v106_v42 = vpop.xlane.xlu1 %105  ;;  %v108_v51 = vmul.f32 %v94_v40, %v90_v36 }
  0xcb   :  { %v114_v44 = vmul.f32 256.0, %v106_v42  ;;  %v113_v46 = vmax.f32 %v112_v43, 0.0 }
  0xcd   :  { %v116_v45 = vsub.f32 %v114_v44, %v115_v41  ;;  %v98_v49 = vpop.xlane.xlu0 %97 }
  0xce   :  { %v107_v50 = vmul.f32 256.0, %v98_v49 }
  0xcf   :  { %v117_v47 = vmax.f32 %v116_v45, 0.0 }
  0xd0   :  { %v109_v52 = vsub.f32 %v107_v50, %v108_v51 }
  0xd1   :  { %v118_v48 = vmul.f32 %v117_v47, %v113_v46 }
  0xd3   :  { %135 = vrsqrt.f32 %v118_v48  ;;  %vm119_vm1 = vcmp.gt.f32.partialorder %v118_v48, 0.0 }
  0xdd   :  { %v136_v53 = vpop.eup %135 }
  0xde   :  { %v121_v54 = vmul.f32 %v136_v53, %v109_v52 }
  0xe0   :  { %v122_v55 = vsel %vm119_vm1, %v121_v54, 0.0 }
  0xe1   :  { %v123_v56 = vsub.f32 1.0, %v122_v55 }
  0xe3   :  { %125 = vst.msk [vmem:[%s232_s2] sm:$0xf] %vm124_vm2, %v123_v56 }
  0xe4   :  { %130 = vsyncpa [#allocation8], 1 }
  0xe5   :  { %131 = vsyncpa [#allocation10], 1 }

</bundles_post_ra>
